<compile_context>
chip_gen: v5e
topology: v5e:2x2
jax: 0.10.0
libtpu: 0.0.40
codegen_flags: <defaults>
</compile_context>

<pallas_src>
import jax
import jax.numpy as jnp
from jax.experimental import pallas as pl
from jax.experimental.pallas import tpu as pltpu

LANE = 128


def _round_up(v, mult):
    return ((v + mult - 1) // mult) * mult


def _cdiv(a, b):
    return -(-a // b)


# --------------------------------------------------------------------------
# Kernel
# --------------------------------------------------------------------------
def autorec_kernel(x_ref, w_enc_ref, b_enc_ref, w_dec_ref, b_dec_ref,
                   o_ref, h_ref):
    # Encoder runs once per batch tile (j == 0); the bf16 hidden activation is
    # reused for every decoder-output-column tile of this batch tile.
    @pl.when(pl.program_id(1) == 0)
    def _():
        h = jnp.dot(x_ref[...], w_enc_ref[...],           # bf16 x bf16, f32 acc
                    preferred_element_type=jnp.float32)
        h_ref[...] = jnp.tanh(h + b_enc_ref[...]).astype(jnp.bfloat16)

    # Decoder: one lane-dense column tile of the output per grid step.
    y = jnp.dot(h_ref[...], w_dec_ref[...],               # bf16 x bf16, f32 acc
                preferred_element_type=jnp.float32)
    o_ref[...] = jax.nn.sigmoid(y + b_dec_ref[...])


# --------------------------------------------------------------------------
# One-time parameter preparation (hoisted out of the per-call hot path).
# PyTorch layouts: w_enc [m, n], b_enc [m], w_dec [n, m], b_dec [n].
# --------------------------------------------------------------------------
def prepare_params(w_enc, b_enc, w_dec, b_dec, weight_dtype=jnp.bfloat16):
    m, n = w_enc.shape
    n_pad = _round_up(n, LANE)
    m_pad = _round_up(m, LANE)

    w_enc_t = jnp.zeros((n_pad, m_pad), weight_dtype).at[:n, :m].set(
        jnp.asarray(w_enc, jnp.float32).T.astype(weight_dtype))
    w_dec_t = jnp.zeros((m_pad, n_pad), weight_dtype).at[:m, :n].set(
        jnp.asarray(w_dec, jnp.float32).T.astype(weight_dtype))
    b_enc_row = jnp.zeros((1, m_pad), jnp.float32).at[0, :m].set(
        jnp.asarray(b_enc, jnp.float32))
    b_dec_row = jnp.zeros((1, n_pad), jnp.float32).at[0, :n].set(
        jnp.asarray(b_dec, jnp.float32))

    return dict(w_enc_t=w_enc_t, b_enc=b_enc_row,
                w_dec_t=w_dec_t, b_dec=b_dec_row,
                n=n, m=m, n_pad=n_pad, m_pad=m_pad)


# --------------------------------------------------------------------------
# Tiling / VMEM-budget helpers
# --------------------------------------------------------------------------
def _vmem_budget_bytes():
    # 0.75x physical VMEM: ~96 MiB on v5e/v6e (128 MiB), ~48 MiB on v7x (64 MiB).
    try:
        cap = int(pltpu.get_tpu_info().vmem_capacity_bytes)
    except Exception:
        cap = 64 * 1024 * 1024        # conservative fallback (v7x per-TC VMEM)
    return cap * 3 // 4


def _select_tn(n_pad, m_pad, vmem_budget):
    # Fully resident w_dec (DMA'd exactly once per call) when it fits easily.
    if m_pad * n_pad * 2 <= min(vmem_budget // 8, 8 << 20) and n_pad <= 4096:
        return n_pad
    # Otherwise: largest 128-multiple column tile that divides n_pad
    # (>=256 preferred for the 256-wide MXU path on v6e/v7x).
    for cand in (2048, 1024, 512, 256):
        if n_pad % cand == 0:
            return cand
    return LANE


def _select_tb(B, tb_max):
    num_tiles = _cdiv(B, tb_max)
    if B >= 2 * 8:
        num_tiles = max(num_tiles, 2)   # keep both v7x TensorCores busy
    return _round_up(_cdiv(B, num_tiles), 8)


def _estimate_vmem(tb, tn, n_pad, m_pad):
    resident_dec = tn == n_pad
    kd = 1 if resident_dec else 2       # w_dec / b_dec buffering
    return (2 * tb * n_pad * 2          # x tiles (bf16, double-buffered)
            + 1 * n_pad * m_pad * 2     # w_enc (bf16, single-buffered)
            + 8 * m_pad * 4             # b_enc (sublane-padded f32)
            + kd * m_pad * tn * 2       # w_dec (bf16)
            + kd * 8 * tn * 4           # b_dec
            + 2 * tb * tn * 4           # output tiles (f32, double-buffered)
            + tb * m_pad * 2)           # h scratch (bf16)


# --------------------------------------------------------------------------
# Forward wrapper
# --------------------------------------------------------------------------
def autorec_forward(x, params, *, tb_max=512):
    n = params["n"]
    n_pad, m_pad = params["n_pad"], params["m_pad"]

    B = x.shape[0]
    budget = _vmem_budget_bytes()
    tn = _select_tn(n_pad, m_pad, budget)
    tb = _select_tb(B, tb_max)
    # Shrink the batch tile if the estimated footprint busts the VMEM budget.
    # TODO(synk): for very large n (>~15k items) on v7x, K-tile the encoder
    # contraction over n (pltpu.emit_pipeline from HBM) instead of keeping the
    # full x row tile + w_enc resident.
    while tb > 8 and _estimate_vmem(tb, tn, n_pad, m_pad) > budget:
        tb = max(8, _round_up(tb // 2, 8))

    B_pad = _round_up(B, tb)
    grid = (B_pad // tb, n_pad // tn)
    resident_dec = tn == n_pad

    # Single fused pad + bf16 cast of the input (no extra f32 copy in HBM).
    x_p = x.astype(jnp.bfloat16)
    if B_pad != B or n_pad != n:
        x_p = jnp.pad(x_p, ((0, B_pad - B), (0, n_pad - n)))

    def run(single_buffer_consts):
        def spec(shape, imap, constant=False):
            if constant and single_buffer_consts:
                return pl.BlockSpec(shape, imap, pipeline_mode=pl.Buffered(1))
            return pl.BlockSpec(shape, imap)

        return pl.pallas_call(
            autorec_kernel,
            out_shape=jax.ShapeDtypeStruct((B_pad, n_pad), jnp.float32),
            grid_spec=pltpu.PrefetchScalarGridSpec(
                num_scalar_prefetch=0,
                grid=grid,
                in_specs=[
                    pl.BlockSpec((tb, n_pad), lambda i, j: (i, 0)),        # x
                    spec((n_pad, m_pad), lambda i, j: (0, 0), True),        # w_enc
                    spec((1, m_pad), lambda i, j: (0, 0), True),            # b_enc
                    spec((m_pad, tn), lambda i, j: (0, j), resident_dec),   # w_dec
                    spec((1, tn), lambda i, j: (0, j), resident_dec),       # b_dec
                ],
                out_specs=pl.BlockSpec((tb, tn), lambda i, j: (i, j)),
                scratch_shapes=[pltpu.VMEM((tb, m_pad), jnp.bfloat16)],     # h
            ),
            compiler_params=pltpu.CompilerParams(
                # j ("arbitrary") must stay innermost & un-split: the h
                # scratch written at j==0 is reused across all j of a tile.
                dimension_semantics=("parallel", "arbitrary"),
                vmem_limit_bytes=budget,
            ),
        )(x_p, params["w_enc_t"], params["b_enc"],
          params["w_dec_t"], params["b_dec"])

    try:
        out = jax.block_until_ready(run(True))
    except Exception:
        # Fallback if this jax/Mosaic build rejects pipeline_mode=Buffered(1).
        out = jax.block_until_ready(run(False))

    return out[:B, :n]


# --------------------------------------------------------------------------
# Pure-JAX reference (f32, PyTorch semantics)
# --------------------------------------------------------------------------
def reference_forward(x, w_enc, b_enc, w_dec, b_dec):
    x = x.astype(jnp.float32)
    h = jnp.tanh(x @ w_enc.T + b_enc)
    return jax.nn.sigmoid(h @ w_dec.T + b_dec)


if __name__ == "__main__":
    # AutoRec over n items with hidden size m; batch of B user rating vectors.
    B, n, m = 8, 64, 32

    key = jax.random.PRNGKey(0)
    kx, k1, k2, k3, k4 = jax.random.split(key, 5)

    x = jax.random.uniform(kx, (B, n), dtype=jnp.float32)   # ratings-like input

    # Deterministic parameter init (PyTorch nn.Linear shapes: weight [out, in]).
    bound_enc = 1.0 / (n ** 0.5)
    bound_dec = 1.0 / (m ** 0.5)
    w_enc = jax.random.uniform(k1, (m, n), jnp.float32, -bound_enc, bound_enc)
    b_enc = jax.random.uniform(k2, (m,), jnp.float32, -bound_enc, bound_enc)
    w_dec = jax.random.uniform(k3, (n, m), jnp.float32, -bound_dec, bound_dec)
    b_dec = jax.random.uniform(k4, (n,), jnp.float32, -bound_dec, bound_dec)

    # One-time param prep (transpose + pad + bf16) outside the hot path.
    params = prepare_params(w_enc, b_enc, w_dec, b_dec)

    out = autorec_forward(x, params)
    out = jax.block_until_ready(out)

    ref = reference_forward(x, w_enc, b_enc, w_dec, b_dec)
    assert out.shape == (B, n)
    # bf16 x / weights / hidden streaming -> loosened tolerance vs f32 reference.
    assert jnp.allclose(out, ref, atol=2e-2, rtol=2e-2), "mismatch vs reference"

    print("KERNEL_OK")
</pallas_src>

<mosaic_0001>
module attributes {stable_mosaic.version = 11 : i64} {
  func.func @autorec_kernel(%arg0: i32, %arg1: i32, %arg2: memref<8x128xbf16, #tpu.memory_space<vmem>>, %arg3: memref<128x128xbf16, #tpu.memory_space<vmem>>, %arg4: memref<1x128xf32, #tpu.memory_space<vmem>>, %arg5: memref<128x128xbf16, #tpu.memory_space<vmem>>, %arg6: memref<1x128xf32, #tpu.memory_space<vmem>>, %arg7: memref<8x128xf32, #tpu.memory_space<vmem>>, %arg8: memref<8x128xbf16, #tpu.memory_space<vmem>>) attributes {dimension_semantics = [#tpu.dimension_semantics<parallel>, #tpu.dimension_semantics<arbitrary>], iteration_bounds = array<i64: 1, 1>, scalar_prefetch = 0 : i64, scratch_operands = 1 : i64, tpu.core_type = #tpu.core_type<tc>, window_params = [{transform_indices = @transform_0, window_bounds = array<i64: 8, 128>}, {pipeline_mode = #tpu.pipeline_mode<synchronous>, transform_indices = @transform_1, window_bounds = array<i64: 128, 128>}, {pipeline_mode = #tpu.pipeline_mode<synchronous>, transform_indices = @transform_2, window_bounds = array<i64: 1, 128>}, {pipeline_mode = #tpu.pipeline_mode<synchronous>, transform_indices = @transform_3, window_bounds = array<i64: 128, 128>}, {pipeline_mode = #tpu.pipeline_mode<synchronous>, transform_indices = @transform_4, window_bounds = array<i64: 1, 128>}, {transform_indices = @transform_5, window_bounds = array<i64: 8, 128>}]} {
    %c0_i32 = arith.constant 0 : i32
    %0 = arith.cmpi eq, %arg1, %c0_i32 : i32
    %1 = arith.extui %0 : i1 to i32
    %c0_i32_0 = arith.constant 0 : i32
    %2 = arith.cmpi ne, %1, %c0_i32_0 : i32
    scf.if %2 {
      %c0_9 = arith.constant 0 : index
      %c0_10 = arith.constant 0 : index
      %15 = vector.load %arg2[%c0_9, %c0_10] : memref<8x128xbf16, #tpu.memory_space<vmem>>, vector<8x128xbf16>
      %c0_11 = arith.constant 0 : index
      %c0_12 = arith.constant 0 : index
      %16 = vector.load %arg3[%c0_11, %c0_12] : memref<128x128xbf16, #tpu.memory_space<vmem>>, vector<128x128xbf16>
      %cst_13 = arith.constant dense<0.000000e+00> : vector<8x128xf32>
      %17 = tpu.matmul %15, %16, %cst_13 {dimension_numbers = #tpu.dot_dimension_numbers<[1], [0], [0], [1], [0, 0, 1, 1], [], []>} : vector<8x128xbf16>, vector<128x128xbf16>, vector<8x128xf32> -> vector<8x128xf32>
      %c0_14 = arith.constant 0 : index
      %c0_15 = arith.constant 0 : index
      %18 = vector.load %arg4[%c0_14, %c0_15] : memref<1x128xf32, #tpu.memory_space<vmem>>, vector<1x128xf32>
      %19 = vector.broadcast %18 : vector<1x128xf32> to vector<8x128xf32>
      %20 = arith.addf %17, %19 : vector<8x128xf32>
      %21 = math.tanh %20 : vector<8x128xf32>
      %22 = arith.truncf %21 : vector<8x128xf32> to vector<8x128xbf16>
      %c0_16 = arith.constant 0 : index
      %c0_17 = arith.constant 0 : index
      %23 = vector.load %arg8[%c0_16, %c0_17] : memref<8x128xbf16, #tpu.memory_space<vmem>>, vector<8x128xbf16>
      tpu.vector_store %arg8[%c0_16, %c0_17], %22 {strides = array<i32>} : memref<8x128xbf16, #tpu.memory_space<vmem>>, vector<8x128xbf16>,
    } else {
    }
    %c0 = arith.constant 0 : index
    %c0_1 = arith.constant 0 : index
    %3 = vector.load %arg8[%c0, %c0_1] : memref<8x128xbf16, #tpu.memory_space<vmem>>, vector<8x128xbf16>
    %c0_2 = arith.constant 0 : index
    %c0_3 = arith.constant 0 : index
    %4 = vector.load %arg5[%c0_2, %c0_3] : memref<128x128xbf16, #tpu.memory_space<vmem>>, vector<128x128xbf16>
    %cst = arith.constant dense<0.000000e+00> : vector<8x128xf32>
    %5 = tpu.matmul %3, %4, %cst {dimension_numbers = #tpu.dot_dimension_numbers<[1], [0], [0], [1], [0, 0, 1, 1], [], []>} : vector<8x128xbf16>, vector<128x128xbf16>, vector<8x128xf32> -> vector<8x128xf32>
    %c0_4 = arith.constant 0 : index
    %c0_5 = arith.constant 0 : index
    %6 = vector.load %arg6[%c0_4, %c0_5] : memref<1x128xf32, #tpu.memory_space<vmem>>, vector<1x128xf32>
    %7 = vector.broadcast %6 : vector<1x128xf32> to vector<8x128xf32>
    %8 = arith.addf %5, %7 : vector<8x128xf32>
    %9 = arith.negf %8 : vector<8x128xf32>
    %10 = math.exp %9 : vector<8x128xf32>
    %cst_6 = arith.constant 1.000000e+00 : f32
    %11 = vector.broadcast %cst_6 : f32 to vector<8x128xf32>
    %12 = arith.addf %11, %10 : vector<8x128xf32>
    %13 = arith.divf %11, %12 : vector<8x128xf32>
    %c0_7 = arith.constant 0 : index
    %c0_8 = arith.constant 0 : index
    %14 = vector.load %arg7[%c0_7, %c0_8] : memref<8x128xf32, #tpu.memory_space<vmem>>, vector<8x128xf32>
    tpu.vector_store %arg7[%c0_7, %c0_8], %13 {strides = array<i32>} : memref<8x128xf32, #tpu.memory_space<vmem>>, vector<8x128xf32>,
    return
  }
  func.func @transform_0(%arg0: i32, %arg1: i32) -> (i32, i32) {
    %c0_i32 = arith.constant 0 : i32
    %c0_i32_0 = arith.constant 0 : i32
    return %arg0, %c0_i32 : i32, i32
  }
  func.func @transform_1(%arg0: i32, %arg1: i32) -> (i32, i32) {
    %c0_i32 = arith.constant 0 : i32
    %c0_i32_0 = arith.constant 0 : i32
    %c0_i32_1 = arith.constant 0 : i32
    return %c0_i32, %c0_i32_0 : i32, i32
  }
  func.func @transform_2(%arg0: i32, %arg1: i32) -> (i32, i32) {
    %c0_i32 = arith.constant 0 : i32
    %c0_i32_0 = arith.constant 0 : i32
    %c0_i32_1 = arith.constant 0 : i32
    return %c0_i32, %c0_i32_0 : i32, i32
  }
  func.func @transform_3(%arg0: i32, %arg1: i32) -> (i32, i32) {
    %c0_i32 = arith.constant 0 : i32
    %c0_i32_0 = arith.constant 0 : i32
    return %c0_i32, %arg1 : i32, i32
  }
  func.func @transform_4(%arg0: i32, %arg1: i32) -> (i32, i32) {
    %c0_i32 = arith.constant 0 : i32
    %c0_i32_0 = arith.constant 0 : i32
    return %c0_i32, %arg1 : i32, i32
  }
  func.func @transform_5(%arg0: i32, %arg1: i32) -> (i32, i32) {
    %c0_i32 = arith.constant 0 : i32
    return %arg0, %arg1 : i32, i32
  }
}

module attributes {stable_mosaic.version = 11 : i64} {
  func.func @autorec_kernel(%arg0: i32, %arg1: i32, %arg2: memref<8x128xbf16, #tpu.memory_space<vmem>>, %arg3: memref<128x128xbf16, #tpu.memory_space<vmem>>, %arg4: memref<1x128xf32, #tpu.memory_space<vmem>>, %arg5: memref<128x128xbf16, #tpu.memory_space<vmem>>, %arg6: memref<1x128xf32, #tpu.memory_space<vmem>>, %arg7: memref<8x128xf32, #tpu.memory_space<vmem>>, %arg8: memref<8x128xbf16, #tpu.memory_space<vmem>>) attributes {dimension_semantics = [#tpu.dimension_semantics<parallel>, #tpu.dimension_semantics<arbitrary>], iteration_bounds = array<i64: 1, 1>, scalar_prefetch = 0 : i64, scratch_operands = 1 : i64, tpu.core_type = #tpu.core_type<tc>, window_params = [{transform_indices = @transform_0, window_bounds = array<i64: 8, 128>}, {pipeline_mode = #tpu.pipeline_mode<synchronous>, transform_indices = @transform_1, window_bounds = array<i64: 128, 128>}, {pipeline_mode = #tpu.pipeline_mode<synchronous>, transform_indices = @transform_2, window_bounds = array<i64: 1, 128>}, {transform_indices = @transform_3, window_bounds = array<i64: 128, 128>}, {transform_indices = @transform_4, window_bounds = array<i64: 1, 128>}, {transform_indices = @transform_5, window_bounds = array<i64: 8, 128>}]} {
    %c0_i32 = arith.constant 0 : i32
    %0 = arith.cmpi eq, %arg1, %c0_i32 : i32
    %1 = arith.extui %0 : i1 to i32
    %c0_i32_0 = arith.constant 0 : i32
    %2 = arith.cmpi ne, %1, %c0_i32_0 : i32
    scf.if %2 {
      %c0_9 = arith.constant 0 : index
      %c0_10 = arith.constant 0 : index
      %15 = vector.load %arg2[%c0_9, %c0_10] : memref<8x128xbf16, #tpu.memory_space<vmem>>, vector<8x128xbf16>
      %c0_11 = arith.constant 0 : index
      %c0_12 = arith.constant 0 : index
      %16 = vector.load %arg3[%c0_11, %c0_12] : memref<128x128xbf16, #tpu.memory_space<vmem>>, vector<128x128xbf16>
      %cst_13 = arith.constant dense<0.000000e+00> : vector<8x128xf32>
      %17 = tpu.matmul %15, %16, %cst_13 {dimension_numbers = #tpu.dot_dimension_numbers<[1], [0], [0], [1], [0, 0, 1, 1], [], []>} : vector<8x128xbf16>, vector<128x128xbf16>, vector<8x128xf32> -> vector<8x128xf32>
      %c0_14 = arith.constant 0 : index
      %c0_15 = arith.constant 0 : index
      %18 = vector.load %arg4[%c0_14, %c0_15] : memref<1x128xf32, #tpu.memory_space<vmem>>, vector<1x128xf32>
      %19 = vector.broadcast %18 : vector<1x128xf32> to vector<8x128xf32>
      %20 = arith.addf %17, %19 : vector<8x128xf32>
      %21 = math.tanh %20 : vector<8x128xf32>
      %22 = arith.truncf %21 : vector<8x128xf32> to vector<8x128xbf16>
      %c0_16 = arith.constant 0 : index
      %c0_17 = arith.constant 0 : index
      %23 = vector.load %arg8[%c0_16, %c0_17] : memref<8x128xbf16, #tpu.memory_space<vmem>>, vector<8x128xbf16>
      tpu.vector_store %arg8[%c0_16, %c0_17], %22 {strides = array<i32>} : memref<8x128xbf16, #tpu.memory_space<vmem>>, vector<8x128xbf16>,
    } else {
    }
    %c0 = arith.constant 0 : index
    %c0_1 = arith.constant 0 : index
    %3 = vector.load %arg8[%c0, %c0_1] : memref<8x128xbf16, #tpu.memory_space<vmem>>, vector<8x128xbf16>
    %c0_2 = arith.constant 0 : index
    %c0_3 = arith.constant 0 : index
    %4 = vector.load %arg5[%c0_2, %c0_3] : memref<128x128xbf16, #tpu.memory_space<vmem>>, vector<128x128xbf16>
    %cst = arith.constant dense<0.000000e+00> : vector<8x128xf32>
    %5 = tpu.matmul %3, %4, %cst {dimension_numbers = #tpu.dot_dimension_numbers<[1], [0], [0], [1], [0, 0, 1, 1], [], []>} : vector<8x128xbf16>, vector<128x128xbf16>, vector<8x128xf32> -> vector<8x128xf32>
    %c0_4 = arith.constant 0 : index
    %c0_5 = arith.constant 0 : index
    %6 = vector.load %arg6[%c0_4, %c0_5] : memref<1x128xf32, #tpu.memory_space<vmem>>, vector<1x128xf32>
    %7 = vector.broadcast %6 : vector<1x128xf32> to vector<8x128xf32>
    %8 = arith.addf %5, %7 : vector<8x128xf32>
    %9 = arith.negf %8 : vector<8x128xf32>
    %10 = math.exp %9 : vector<8x128xf32>
    %cst_6 = arith.constant 1.000000e+00 : f32
    %11 = vector.broadcast %cst_6 : f32 to vector<8x128xf32>
    %12 = arith.addf %11, %10 : vector<8x128xf32>
    %13 = arith.divf %11, %12 : vector<8x128xf32>
    %c0_7 = arith.constant 0 : index
    %c0_8 = arith.constant 0 : index
    %14 = vector.load %arg7[%c0_7, %c0_8] : memref<8x128xf32, #tpu.memory_space<vmem>>, vector<8x128xf32>
    tpu.vector_store %arg7[%c0_7, %c0_8], %13 {strides = array<i32>} : memref<8x128xf32, #tpu.memory_space<vmem>>, vector<8x128xf32>,
    return
  }
  func.func @transform_0(%arg0: i32, %arg1: i32) -> (i32, i32) {
    %c0_i32 = arith.constant 0 : i32
    %c0_i32_0 = arith.constant 0 : i32
    return %arg0, %c0_i32 : i32, i32
  }
  func.func @transform_1(%arg0: i32, %arg1: i32) -> (i32, i32) {
    %c0_i32 = arith.constant 0 : i32
    %c0_i32_0 = arith.constant 0 : i32
    %c0_i32_1 = arith.constant 0 : i32
    return %c0_i32, %c0_i32_0 : i32, i32
  }
  func.func @transform_2(%arg0: i32, %arg1: i32) -> (i32, i32) {
    %c0_i32 = arith.constant 0 : i32
    %c0_i32_0 = arith.constant 0 : i32
    %c0_i32_1 = arith.constant 0 : i32
    return %c0_i32, %c0_i32_0 : i32, i32
  }
  func.func @transform_3(%arg0: i32, %arg1: i32) -> (i32, i32) {
    %c0_i32 = arith.constant 0 : i32
    %c0_i32_0 = arith.constant 0 : i32
    return %c0_i32, %arg1 : i32, i32
  }
  func.func @transform_4(%arg0: i32, %arg1: i32) -> (i32, i32) {
    %c0_i32 = arith.constant 0 : i32
    %c0_i32_0 = arith.constant 0 : i32
    return %c0_i32, %arg1 : i32, i32
  }
  func.func @transform_5(%arg0: i32, %arg1: i32) -> (i32, i32) {
    %c0_i32 = arith.constant 0 : i32
    return %arg0, %arg1 : i32, i32
  }
}

</mosaic_0001>

<bundles_post_ra>
// kernel: tpu_custom_call.1
= control target key start
LH: loop header
LB: loop body
LE: loop exit
PB: predicated region body
PF: predicated region fallthrough
CT: control target
= control target key end

     0   :  { %10 = vsyncpa [#allocation4], 0  ;;  %s526_s0 = inlined_call_operand.hbm [shape: bf16[8,128], index: 0, kind: input, shape index: {}]   ;;  %s527_s1 = inlined_call_operand.hbm [shape: bf16[128,128], index: 1, kind: input, shape index: {}]   ;;  %s528_s2 = inlined_call_operand.vmem [shape: f32[1,128], index: 2, kind: input, shape index: {}]   ;;  %s529_s3 = inlined_call_operand.hbm [shape: bf16[128,128], index: 3, kind: input, shape index: {}]   ;;  %s530_s4 = inlined_call_operand.vmem [shape: f32[1,128], index: 4, kind: input, shape index: {}]   ;;  %s531_s5 = inlined_call_operand.hbm [shape: f32[8,128], index: 5, kind: output, shape index: {}]  }
   0x1   :  { %11 = vsyncpa [#allocation7], 0  ;;  %s28_s20 = sshll.u32 %s527_s1, 4  ;;  %s29_s20 = int_to_ptr.hbm [resolvable:$true] %s28_s20 }
   0x2   :  { %12 = vsyncpa [#allocation5], 0  ;;  %s472_s21 = smov [#allocation6]   ;;  %s18_s25 = sshll.u32 %s526_s0, 4  ;;  %s19_s25 = int_to_ptr.hbm [resolvable:$true] %s18_s25 }
   0x3   :  { %s30_s22 = sshll.u32 %s472_s21, 4  ;;  %s473_s26 = smov 64   ;;  %s31_s22 = int_to_ptr.vmem [resolvable:$true] %s30_s22 }
   0x4   :  { %s474_s27 = smov 4   ;;  %s475_s28 = smov [#allocation3]  }
   0x5   :  { %36 = dma.hbm_to_vmem [thread:$0]  %s29_s20, 1024, %s31_s22, [#allocation7], %s473_s26, %s473_s26, %s474_s27  }
   0x6   :  { %s20_s29 = sshll.u32 %s475_s28, 4  ;;  %s43_s7 = sshll.u32 %s529_s3, 4  ;;  %s21_s29 = int_to_ptr.vmem [resolvable:$true] %s20_s29  ;;  %s44_s7 = int_to_ptr.hbm [resolvable:$true] %s43_s7 }
   0x7   :  { %23 = dma.hbm_to_vmem [thread:$0]  %s19_s25, 64, %s21_s29, [#allocation4]  }
   0x8   :  { %s476_s1 = smov [#allocation8]  }
   0x9   :  { %s45_s8 = sshll.u32 %s476_s1, 4  ;;  %s46_s8 = int_to_ptr.vmem [resolvable:$true] %s45_s8 }
   0xa   :  { %51 = dma.hbm_to_vmem [thread:$0]  %s44_s7, 1024, %s46_s8, [#allocation7], %s473_s26, %s473_s26, %s474_s27  }
   0xb   :  { %466 = dma.done.wait [#allocation4], 64  }
   0xc   :  { %467 = vsyncadd [#allocation4], 4294967232 }
   0xd   :  { %468 = dma.done.wait [#allocation7], 2048  }
   0xe   :  { %469 = vsyncadd [#allocation7], 4294965248  ;;  %v347_v0 = vld [vmem:[#allocation6 + $0x38] sm:$0xff]  ;;  %v346_v1 = vld [vmem:[#allocation6 + $0x30] sm:$0xff] }
   0xf   :  { %139 = vmatpush.bf16.msra.mxu0 %v347_v0  ;;  %v355_v2 = vld [vmem:[#allocation8 + $0x38] sm:$0xff]  ;;  %v354_v3 = vld [vmem:[#allocation8 + $0x30] sm:$0xff]  ;;  %v345_v4 = vld [vmem:[#allocation6 + $0x28] sm:$0xff] }
  0x10   :  { %224 = vmatpush.bf16.msra.mxu1 %v355_v2  ;;  %v353_v5 = vld [vmem:[#allocation8 + $0x28] sm:$0xff]  ;;  %v344_v6 = vld [vmem:[#allocation6 + $0x20] sm:$0xff]  ;;  %v343_v7 = vld [vmem:[#allocation6 + $0x18] sm:$0xff] }
  0x11   :  { %v342_v8 = vld [vmem:[#allocation6 + $0x10] sm:$0xff]  ;;  %v341_v9 = vld [vmem:[#allocation6 + $0x8] sm:$0xff]  ;;  %v340_v10 = vld [vmem:[#allocation6] sm:$0xff] }
  0x12   :  { %v70_v11 = vld [vmem:[#allocation3] sm:$0xf]  ;;  %v352_v12 = vld [vmem:[#allocation8 + $0x20] sm:$0xff]  ;;  %v350_v14 = vld [vmem:[#allocation8 + $0x10] sm:$0xff] }
  0x13   :  { %140 = vmatpush.bf16.msra.mxu0 %v346_v1  ;;  %v351_v13 = vld [vmem:[#allocation8 + $0x18] sm:$0xff]  ;;  %v349_v15 = vld [vmem:[#allocation8 + $0x8] sm:$0xff]  ;;  %v348_v16 = vld [vmem:[#allocation8] sm:$0xff] }
  0x14   :  { %225 = vmatpush.bf16.msra.mxu1 %v354_v3  ;;  %v362_v17 = vld [vmem:[%s528_s2] ss:$0 sm:$0xff]  ;;  %s477_s2 = smov [#allocation9]  }
  0x15   :  { %v363_v24 = vld [vmem:[%s530_s4] ss:$0 sm:$0xff]  ;;  %s262_s11 = sshll.u32 %s477_s2, 4  ;;  %s264_s4 = sshll.u32 %s531_s5, 4  ;;  %s263_s11 = int_to_ptr.vmem [resolvable:$true] %s262_s11  ;;  %s265_s4 = int_to_ptr.hbm [resolvable:$true] %s264_s4 }
  0x17   :  { %141 = vmatpush.bf16.msra.mxu0 %v345_v4 }
  0x18   :  { %226 = vmatpush.bf16.msra.mxu1 %v353_v5 }
  0x1b   :  { %142 = vmatpush.bf16.msra.mxu0 %v344_v6 }
  0x1c   :  { %227 = vmatpush.bf16.msra.mxu1 %v352_v12 }
  0x1f   :  { %143 = vmatpush.bf16.msra.mxu0 %v343_v7 }
  0x20   :  { %228 = vmatpush.bf16.msra.mxu1 %v351_v13 }
  0x23   :  { %144 = vmatpush.bf16.msra.mxu0 %v342_v8 }
  0x24   :  { %229 = vmatpush.bf16.msra.mxu1 %v350_v14 }
  0x27   :  { %145 = vmatpush.bf16.msra.mxu0 %v341_v9 }
  0x28   :  { %230 = vmatpush.bf16.msra.mxu1 %v349_v15 }
  0x2b   :  { %146 = vmatpush.bf16.msra.mxu0 %v340_v10 }
  0x2c   :  { %231 = vmatpush.bf16.msra.mxu1 %v348_v16 }
  0x2e   :  { %147 = vmatmul.bf16.vlgmr.msra.gmra.mxu0 %v70_v11 }
  0xab   :  { %v148_v18 = vpop.f32.mrf.mxu0 }
  0xac   :  { %v149_v19 = vadd.f32 %v362_v17, %v148_v18 }
  0xae   :  { %364 = vtanh.f32 %v149_v19 }
  0xb3   :  { %v150_v20 = vpop.f32.mrf.mxu0 }
  0xb4   :  { %v365_v21 = vpop.eup %364 }
  0xb5   :  { %v153_v22 = vpack.c.bf16 %v365_v21, %v365_v21 }
  0xb7   :  { %154 = vst [vmem:[#allocation2] sm:$0xf] %v153_v22 }
  0xbe   :  { %v155_v23 = vld [vmem:[#allocation2] sm:$0xf] }
  0xbf   :  { %232 = vmatmul.bf16.vlgmr.msra.gmra.mxu1 %v155_v23 }
 0x13c   :  { %v233_v25 = vpop.f32.mrf.mxu1 }
 0x13d   :  { %v234_v26 = vadd.f32 %v363_v24, %v233_v25 }
 0x13f   :  { %v339_v27 = vmul.f32 -1.442695, %v234_v26 }
 0x141   :  { %366 = vpow2.f32 %v339_v27 }
 0x144   :  { %v235_v28 = vpop.f32.mrf.mxu1 }
 0x147   :  { %v367_v29 = vpop.eup %366 }
 0x148   :  { %v240_v30 = vadd.f32 1.0, %v367_v29 }
 0x14a   :  { %368 = vrcp.f32 %v240_v30  ;;  %v252_v34 = vand.u32 2147483648, %v240_v30  ;;  %v250_v36 = vand.u32 2147483647, %v240_v30  ;;  %vm246_vm1 = vweird.f32 %v240_v30 }
 0x14c   :  { %v253_v38 = vor.u32 1.1754944e-38, %v252_v34  ;;  %vm251_vm3 = vcmp.eq.f32.partialorder %v250_v36, 8.507059e+37 }
 0x150   :  { %v369_v31 = vpop.eup %368 }
 0x151   :  { %v242_v32 = vmul.f32 %v369_v31, %v240_v30  ;;  %vm247_vm0 = vweird.f32 %v369_v31 }
 0x152   :  { %vm248_vm2 = vmor %vm246_vm1, %vm247_vm0 }
 0x153   :  { %v243_v33 = vsub.f32 1.0, %v242_v32 }
 0x155   :  { %v244_v35 = vmul.f32 %v369_v31, %v243_v33 }
 0x157   :  { %v245_v37 = vadd.f32 %v369_v31, %v244_v35 }
 0x159   :  { %v249_v39 = vsel %vm248_vm2, %v369_v31, %v245_v37 }
 0x15a   :  { %v254_v40 = vsel %vm251_vm3, %v253_v38, %v249_v39 }
 0x15b   :  { %256 = vst [vmem:[#allocation9] sm:$0xff] %v254_v40 }
 0x15c   :  { %267 = dma.vmem_to_hbm [thread:$0]  %s263_s11, 128, %s265_s4, [#allocation5]  }
 0x15d   :  { %470 = dma.done.wait [#allocation5], 128  }
 0x15e   :  { %471 = vsyncadd [#allocation5], 4294967168 }
 0x15f   :  { %272 = vsyncpa [#allocation4], 1 }
 0x160   :  { %273 = vsyncpa [#allocation7], 1 }
 0x161   :  { %274 = vsyncpa [#allocation5], 1 }

// kernel: tpu_custom_call.1
= control target key start
LH: loop header
LB: loop body
LE: loop exit
PB: predicated region body
PF: predicated region fallthrough
CT: control target
= control target key end

     0   :  { %10 = vsyncpa [#allocation4], 0  ;;  %s526_s0 = inlined_call_operand.hbm [shape: bf16[8,128], index: 0, kind: input, shape index: {}]   ;;  %s527_s1 = inlined_call_operand.hbm [shape: bf16[128,128], index: 1, kind: input, shape index: {}]   ;;  %s528_s2 = inlined_call_operand.vmem [shape: f32[1,128], index: 2, kind: input, shape index: {}]   ;;  %s529_s3 = inlined_call_operand.hbm [shape: bf16[128,128], index: 3, kind: input, shape index: {}]   ;;  %s530_s4 = inlined_call_operand.vmem [shape: f32[1,128], index: 4, kind: input, shape index: {}]   ;;  %s531_s5 = inlined_call_operand.hbm [shape: f32[8,128], index: 5, kind: output, shape index: {}]  }
   0x1   :  { %11 = vsyncpa [#allocation7], 0  ;;  %s28_s20 = sshll.u32 %s527_s1, 4  ;;  %s29_s20 = int_to_ptr.hbm [resolvable:$true] %s28_s20 }
   0x2   :  { %12 = vsyncpa [#allocation5], 0  ;;  %s472_s21 = smov [#allocation6]   ;;  %s18_s25 = sshll.u32 %s526_s0, 4  ;;  %s19_s25 = int_to_ptr.hbm [resolvable:$true] %s18_s25 }
   0x3   :  { %s30_s22 = sshll.u32 %s472_s21, 4  ;;  %s473_s26 = smov 64   ;;  %s31_s22 = int_to_ptr.vmem [resolvable:$true] %s30_s22 }
   0x4   :  { %s474_s27 = smov 4   ;;  %s475_s28 = smov [#allocation3]  }
   0x5   :  { %36 = dma.hbm_to_vmem [thread:$0]  %s29_s20, 1024, %s31_s22, [#allocation7], %s473_s26, %s473_s26, %s474_s27  }
   0x6   :  { %s20_s29 = sshll.u32 %s475_s28, 4  ;;  %s43_s7 = sshll.u32 %s529_s3, 4  ;;  %s21_s29 = int_to_ptr.vmem [resolvable:$true] %s20_s29  ;;  %s44_s7 = int_to_ptr.hbm [resolvable:$true] %s43_s7 }
   0x7   :  { %23 = dma.hbm_to_vmem [thread:$0]  %s19_s25, 64, %s21_s29, [#allocation4]  }
   0x8   :  { %s476_s1 = smov [#allocation8]  }
   0x9   :  { %s45_s8 = sshll.u32 %s476_s1, 4  ;;  %s46_s8 = int_to_ptr.vmem [resolvable:$true] %s45_s8 }
   0xa   :  { %51 = dma.hbm_to_vmem [thread:$0]  %s44_s7, 1024, %s46_s8, [#allocation7], %s473_s26, %s473_s26, %s474_s27  }
   0xb   :  { %466 = dma.done.wait [#allocation4], 64  }
   0xc   :  { %467 = vsyncadd [#allocation4], 4294967232 }
   0xd   :  { %468 = dma.done.wait [#allocation7], 2048  }
   0xe   :  { %469 = vsyncadd [#allocation7], 4294965248  ;;  %v347_v0 = vld [vmem:[#allocation6 + $0x38] sm:$0xff]  ;;  %v346_v1 = vld [vmem:[#allocation6 + $0x30] sm:$0xff] }
   0xf   :  { %139 = vmatpush.bf16.msra.mxu0 %v347_v0  ;;  %v355_v2 = vld [vmem:[#allocation8 + $0x38] sm:$0xff]  ;;  %v354_v3 = vld [vmem:[#allocation8 + $0x30] sm:$0xff]  ;;  %v345_v4 = vld [vmem:[#allocation6 + $0x28] sm:$0xff] }
  0x10   :  { %224 = vmatpush.bf16.msra.mxu1 %v355_v2  ;;  %v353_v5 = vld [vmem:[#allocation8 + $0x28] sm:$0xff]  ;;  %v344_v6 = vld [vmem:[#allocation6 + $0x20] sm:$0xff]  ;;  %v343_v7 = vld [vmem:[#allocation6 + $0x18] sm:$0xff] }
  0x11   :  { %v342_v8 = vld [vmem:[#allocation6 + $0x10] sm:$0xff]  ;;  %v341_v9 = vld [vmem:[#allocation6 + $0x8] sm:$0xff]  ;;  %v340_v10 = vld [vmem:[#allocation6] sm:$0xff] }
  0x12   :  { %v70_v11 = vld [vmem:[#allocation3] sm:$0xf]  ;;  %v352_v12 = vld [vmem:[#allocation8 + $0x20] sm:$0xff]  ;;  %v350_v14 = vld [vmem:[#allocation8 + $0x10] sm:$0xff] }
  0x13   :  { %140 = vmatpush.bf16.msra.mxu0 %v346_v1  ;;  %v351_v13 = vld [vmem:[#allocation8 + $0x18] sm:$0xff]  ;;  %v349_v15 = vld [vmem:[#allocation8 + $0x8] sm:$0xff]  ;;  %v348_v16 = vld [vmem:[#allocation8] sm:$0xff] }
  0x14   :  { %225 = vmatpush.bf16.msra.mxu1 %v354_v3  ;;  %v362_v17 = vld [vmem:[%s528_s2] ss:$0 sm:$0xff]  ;;  %s477_s2 = smov [#allocation9]  }
  0x15   :  { %v363_v24 = vld [vmem:[%s530_s4] ss:$0 sm:$0xff]  ;;  %s262_s11 = sshll.u32 %s477_s2, 4  ;;  %s264_s4 = sshll.u32 %s531_s5, 4  ;;  %s263_s11 = int_to_ptr.vmem [resolvable:$true] %s262_s11  ;;  %s265_s4 = int_to_ptr.hbm [resolvable:$true] %s264_s4 }
  0x17   :  { %141 = vmatpush.bf16.msra.mxu0 %v345_v4 }
  0x18   :  { %226 = vmatpush.bf16.msra.mxu1 %v353_v5 }
  0x1b   :  { %142 = vmatpush.bf16.msra.mxu0 %v344_v6 }
  0x1c   :  { %227 = vmatpush.bf16.msra.mxu1 %v352_v12 }
  0x1f   :  { %143 = vmatpush.bf16.msra.mxu0 %v343_v7 }
  0x20   :  { %228 = vmatpush.bf16.msra.mxu1 %v351_v13 }
  0x23   :  { %144 = vmatpush.bf16.msra.mxu0 %v342_v8 }
  0x24   :  { %229 = vmatpush.bf16.msra.mxu1 %v350_v14 }
  0x27   :  { %145 = vmatpush.bf16.msra.mxu0 %v341_v9 }
  0x28   :  { %230 = vmatpush.bf16.msra.mxu1 %v349_v15 }
  0x2b   :  { %146 = vmatpush.bf16.msra.mxu0 %v340_v10 }
  0x2c   :  { %231 = vmatpush.bf16.msra.mxu1 %v348_v16 }
  0x2e   :  { %147 = vmatmul.bf16.vlgmr.msra.gmra.mxu0 %v70_v11 }
  0xab   :  { %v148_v18 = vpop.f32.mrf.mxu0 }
  0xac   :  { %v149_v19 = vadd.f32 %v362_v17, %v148_v18 }
  0xae   :  { %364 = vtanh.f32 %v149_v19 }
  0xb3   :  { %v150_v20 = vpop.f32.mrf.mxu0 }
  0xb4   :  { %v365_v21 = vpop.eup %364 }
  0xb5   :  { %v153_v22 = vpack.c.bf16 %v365_v21, %v365_v21 }
  0xb7   :  { %154 = vst [vmem:[#allocation2] sm:$0xf] %v153_v22 }
  0xbe   :  { %v155_v23 = vld [vmem:[#allocation2] sm:$0xf] }
  0xbf   :  { %232 = vmatmul.bf16.vlgmr.msra.gmra.mxu1 %v155_v23 }
 0x13c   :  { %v233_v25 = vpop.f32.mrf.mxu1 }
 0x13d   :  { %v234_v26 = vadd.f32 %v363_v24, %v233_v25 }
 0x13f   :  { %v339_v27 = vmul.f32 -1.442695, %v234_v26 }
 0x141   :  { %366 = vpow2.f32 %v339_v27 }
 0x144   :  { %v235_v28 = vpop.f32.mrf.mxu1 }
 0x147   :  { %v367_v29 = vpop.eup %366 }
 0x148   :  { %v240_v30 = vadd.f32 1.0, %v367_v29 }
 0x14a   :  { %368 = vrcp.f32 %v240_v30  ;;  %v252_v34 = vand.u32 2147483648, %v240_v30  ;;  %v250_v36 = vand.u32 2147483647, %v240_v30  ;;  %vm246_vm1 = vweird.f32 %v240_v30 }
 0x14c   :  { %v253_v38 = vor.u32 1.1754944e-38, %v252_v34  ;;  %vm251_vm3 = vcmp.eq.f32.partialorder %v250_v36, 8.507059e+37 }
 0x150   :  { %v369_v31 = vpop.eup %368 }
 0x151   :  { %v242_v32 = vmul.f32 %v369_v31, %v240_v30  ;;  %vm247_vm0 = vweird.f32 %v369_v31 }
 0x152   :  { %vm248_vm2 = vmor %vm246_vm1, %vm247_vm0 }
 0x153   :  { %v243_v33 = vsub.f32 1.0, %v242_v32 }
 0x155   :  { %v244_v35 = vmul.f32 %v369_v31, %v243_v33 }
 0x157   :  { %v245_v37 = vadd.f32 %v369_v31, %v244_v35 }
 0x159   :  { %v249_v39 = vsel %vm248_vm2, %v369_v31, %v245_v37 }
 0x15a   :  { %v254_v40 = vsel %vm251_vm3, %v253_v38, %v249_v39 }
 0x15b   :  { %256 = vst [vmem:[#allocation9] sm:$0xff] %v254_v40 }
 0x15c   :  { %267 = dma.vmem_to_hbm [thread:$0]  %s263_s11, 128, %s265_s4, [#allocation5]  }
 0x15d   :  { %470 = dma.done.wait [#allocation5], 128  }
 0x15e   :  { %471 = vsyncadd [#allocation5], 4294967168 }
 0x15f   :  { %272 = vsyncpa [#allocation4], 1 }
 0x160   :  { %273 = vsyncpa [#allocation7], 1 }
 0x161   :  { %274 = vsyncpa [#allocation5], 1 }

</bundles_post_ra>
